<compile_context>
chip_gen: v6e
topology: v6e:2x2x1
jax: 0.10.0
libtpu: 0.0.40
codegen_flags: <defaults>
</compile_context>

<pallas_src>
import functools

import jax
import jax.numpy as jnp
from jax.experimental import pallas as pl
from jax.experimental.pallas import tpu as pltpu


def _l2norm_kernel(x_ref, w_ref, o_ref, *, eps):
    # x_ref/o_ref: (TILE_N, C, TILE_HW), w_ref: (C, 1)
    x = x_ref[...].astype(jnp.float32)                  # (TILE_N, C, TILE_HW)
    w = w_ref[...].astype(jnp.float32)                  # (C, 1) -> lanes broadcast
    sq_sum = jnp.sum(x * x, axis=1, keepdims=True)      # (TILE_N, 1, TILE_HW) sublane reduce
    # torch: norm = sqrt(sum(x^2)) + eps   (eps added AFTER the sqrt)
    inv = pl.reciprocal(jnp.sqrt(sq_sum) + eps, approx=True)   # EUP vrcp (free slot)
    o_ref[...] = (w[None, :, :] * x * inv).astype(o_ref.dtype)


def _cdiv(a, b):
    return -(-a // b)


def _round_up(v, m):
    return ((v + m - 1) // m) * m


def _choose_tiles(n, c, hw, itemsize, target_bytes=2 * 1024 * 1024):
    """Pick (tile_n, tile_hw) giving ~target_bytes of payload per grid step.

    Priorities: lane tile is a multiple of 128 or the full hw (layout-legal);
    avoid masked lane tails; grow the batch tile when one image is small;
    keep >= 2 total grid steps when possible (v7x megacore occupancy).
    """
    bytes_per_col = c * itemsize                      # one spatial column, all channels

    # --- lane (spatial) tile ---
    max_lanes = max(128, (target_bytes // bytes_per_col) // 128 * 128)
    full_hw_bytes = hw * bytes_per_col
    if hw <= max_lanes or full_hw_bytes <= 2 * target_bytes:
        tile_hw = hw                                  # whole spatial extent: no lane tail
    else:
        tile_hw = max_lanes                           # fallback: masked tail block
        for cand in range(max_lanes, 127, -128):
            if hw % cand == 0:                        # exact divisor -> unmasked stores
                tile_hw = cand
                break

    # --- batch tile (grow toward the byte target when one image is small) ---
    block_bytes = c * tile_hw * itemsize
    tile_n = 1
    if tile_hw == hw and block_bytes < target_bytes:
        for cand in range(n, 0, -1):
            if n % cand == 0 and cand * block_bytes <= target_bytes:
                tile_n = cand
                break

    # --- keep >= 2 grid steps so the second v7x TensorCore gets work ---
    if _cdiv(n, tile_n) * _cdiv(hw, tile_hw) == 1:
        if tile_n > 1:
            tile_n = _cdiv(tile_n, 2)
        elif tile_hw > 128:
            half = _round_up(_cdiv(tile_hw, 2), 128)
            if half < tile_hw:
                tile_hw = half

    return tile_n, tile_hw


def l2norm(x, weight, eps=1e-10, tile_n=None, tile_hw=None):
    """x: (N, C, H, W) float array; weight: (C,). Returns same shape/dtype as x."""
    n, c, h, w = x.shape
    hw = h * w
    itemsize = x.dtype.itemsize

    # Free reshapes of the contiguous NCHW buffer — no transpose passes.
    x3d = x.reshape(n, c, hw)
    w2d = weight.reshape(c, 1)

    auto_n, auto_hw = _choose_tiles(n, c, hw, itemsize)
    tile_n = auto_n if tile_n is None else tile_n
    tile_hw = auto_hw if tile_hw is None else tile_hw

    grid = (pl.cdiv(n, tile_n), pl.cdiv(hw, tile_hw))  # tails are masked on writeback

    # Pipeline VMEM footprint: (in + out) blocks, double-buffered, + weight/slack.
    block_bytes = tile_n * c * tile_hw * itemsize
    vmem_limit = int(min(64 << 20, max(32 << 20, 4 * block_bytes + (4 << 20))))

    cost = pl.CostEstimate(
        flops=4 * n * c * hw,                           # square, sum, w-mul, inv-mul
        transcendentals=2 * n * hw,                     # sqrt + reciprocal per column
        bytes_accessed=2 * n * c * hw * itemsize + c * weight.dtype.itemsize,
    )

    out3d = pl.pallas_call(
        functools.partial(_l2norm_kernel, eps=eps),
        out_shape=jax.ShapeDtypeStruct((n, c, hw), x.dtype),
        grid_spec=pltpu.PrefetchScalarGridSpec(
            num_scalar_prefetch=0,
            grid=grid,
            in_specs=[
                pl.BlockSpec((tile_n, c, tile_hw), lambda i, j: (i, 0, j)),
                pl.BlockSpec((c, 1), lambda i, j: (0, 0)),   # weight stays resident
            ],
            out_specs=pl.BlockSpec((tile_n, c, tile_hw), lambda i, j: (i, 0, j)),
        ),
        compiler_params=pltpu.CompilerParams(
            # Every block is independent -> both axes parallel (v7x megacore
            # shards them across its 2 TensorCores; neutral on v5e/v6e).
            dimension_semantics=("parallel", "parallel"),
            vmem_limit_bytes=vmem_limit,
        ),
        cost_estimate=cost,
    )(x3d, w2d)

    return out3d.reshape(n, c, h, w)


if __name__ == "__main__":
    key = jax.random.PRNGKey(0)
    N, C, H, W = 2, 4, 16, 16
    scale = 20.0
    eps = 1e-10

    x = jax.random.normal(key, (N, C, H, W), dtype=jnp.float32)
    # Deterministic parameter init: SSD initializes L2Norm.weight to `scale`.
    weight = jnp.full((C,), scale, dtype=jnp.float32)

    out = l2norm(x, weight, eps=eps)
    out = jax.block_until_ready(out)

    # Reference (plain JAX, same math as the torch forward).
    xf = x.astype(jnp.float32)
    norm = jnp.sqrt(jnp.sum(xf * xf, axis=1, keepdims=True)) + eps
    ref = (weight[None, :, None, None] * xf / norm).astype(x.dtype)

    assert out.shape == x.shape and out.dtype == x.dtype
    # approx reciprocal (EUP vrcp) -> relative tolerance; any real indexing /
    # reduction / broadcast bug produces O(1) relative errors, far above this.
    err_ok = jnp.abs(out - ref) <= (1e-3 + 1e-2 * jnp.abs(ref))
    assert bool(jnp.all(err_ok))

    print("KERNEL_OK")
</pallas_src>

<mosaic_0001>
module attributes {stable_mosaic.version = 11 : i64} {
  func.func @_l2norm_kernel(%arg0: i32, %arg1: i32, %arg2: memref<1x4x256xf32, #tpu.memory_space<vmem>>, %arg3: memref<4x1xf32, #tpu.memory_space<vmem>>, %arg4: memref<1x4x256xf32, #tpu.memory_space<vmem>>) attributes {dimension_semantics = [#tpu.dimension_semantics<parallel>, #tpu.dimension_semantics<parallel>], iteration_bounds = array<i64: 2, 1>, scalar_prefetch = 0 : i64, scratch_operands = 0 : i64, tpu.core_type = #tpu.core_type<tc>, window_params = [{transform_indices = @transform_0, window_bounds = array<i64: 1, 4, 256>}, {pipeline_mode = #tpu.pipeline_mode<synchronous>, transform_indices = @transform_1, window_bounds = array<i64: 4, 1>}, {transform_indices = @transform_2, window_bounds = array<i64: 1, 4, 256>}]} {
    %c0 = arith.constant 0 : index
    %c0_0 = arith.constant 0 : index
    %c0_1 = arith.constant 0 : index
    %0 = vector.load %arg2[%c0, %c0_0, %c0_1] : memref<1x4x256xf32, #tpu.memory_space<vmem>>, vector<1x4x256xf32>
    %c0_2 = arith.constant 0 : index
    %c0_3 = arith.constant 0 : index
    %1 = vector.load %arg3[%c0_2, %c0_3] : memref<4x1xf32, #tpu.memory_space<vmem>>, vector<4x1xf32>
    %2 = arith.mulf %0, %0 : vector<1x4x256xf32>
    %cst = arith.constant dense<0.000000e+00> : vector<1x256xf32>
    %3 = vector.multi_reduction <add>, %2, %cst [1] : vector<1x4x256xf32> to vector<1x256xf32>
    %4 = vector.shape_cast %3 : vector<1x256xf32> to vector<1x1x256xf32>
    %5 = math.sqrt %4 : vector<1x1x256xf32>
    %cst_4 = arith.constant 1.000000e-10 : f32
    %6 = vector.broadcast %cst_4 : f32 to vector<1x1x256xf32>
    %7 = arith.addf %5, %6 : vector<1x1x256xf32>
    %8 = tpu.reciprocal %7 {approx = true} : vector<1x1x256xf32> -> vector<1x1x256xf32>
    %9 = vector.shape_cast %1 : vector<4x1xf32> to vector<1x4x1xf32>
    %10 = vector.broadcast %9 : vector<1x4x1xf32> to vector<1x4x256xf32>
    %11 = arith.mulf %10, %0 : vector<1x4x256xf32>
    %12 = vector.broadcast %8 : vector<1x1x256xf32> to vector<1x4x256xf32>
    %13 = arith.mulf %11, %12 : vector<1x4x256xf32>
    %c0_5 = arith.constant 0 : index
    %c0_6 = arith.constant 0 : index
    %c0_7 = arith.constant 0 : index
    %14 = vector.load %arg4[%c0_5, %c0_6, %c0_7] : memref<1x4x256xf32, #tpu.memory_space<vmem>>, vector<1x4x256xf32>
    tpu.vector_store %arg4[%c0_5, %c0_6, %c0_7], %13 {strides = array<i32>} : memref<1x4x256xf32, #tpu.memory_space<vmem>>, vector<1x4x256xf32>,
    return
  }
  func.func @transform_0(%arg0: i32, %arg1: i32) -> (i32, i32, i32) {
    %c0_i32 = arith.constant 0 : i32
    %c0_i32_0 = arith.constant 0 : i32
    return %arg0, %c0_i32, %arg1 : i32, i32, i32
  }
  func.func @transform_1(%arg0: i32, %arg1: i32) -> (i32, i32) {
    %c0_i32 = arith.constant 0 : i32
    %c0_i32_0 = arith.constant 0 : i32
    %c0_i32_1 = arith.constant 0 : i32
    return %c0_i32, %c0_i32_0 : i32, i32
  }
  func.func @transform_2(%arg0: i32, %arg1: i32) -> (i32, i32, i32) {
    %c0_i32 = arith.constant 0 : i32
    %c0_i32_0 = arith.constant 0 : i32
    return %arg0, %c0_i32, %arg1 : i32, i32, i32
  }
}

</mosaic_0001>

<bundles_post_ra>
// kernel: tpu_custom_call.1
= control target key start
LH: loop header
LB: loop body
LE: loop exit
PB: predicated region body
PF: predicated region fallthrough
CT: control target
= control target key end

     0   :  { %7 = vsyncpa [#allocation3], 0  ;;  %s696_s0 = inlined_call_operand.hbm [shape: f32[2,4,256], index: 0, kind: input, shape index: {}]   ;;  %s697_s1 = inlined_call_operand.vmem [shape: f32[4,1], index: 1, kind: input, shape index: {}]   ;;  %s698_s2 = inlined_call_operand.hbm [shape: f32[2,4,256], index: 2, kind: output, shape index: {}]  }
   0x1   :  { %9 = vsyncpa [#allocation3 + $0x1], 0 }
   0x2   :  { %10 = vsyncpa [#allocation4], 0 }
   0x3   :  { %12 = vsyncpa [#allocation4 + $0x1], 0  ;;  %s555_s9 = smov 0   ;;  %s557_s10 = smov 0  }
   0x4   :  { %s559_s11 = smov 0   ;;  %s561_s12 = smov 0  }
   0x5   :  { %s563_s13 = smov 0   ;;  %s565_s14 = smov 0  }
   0x6 LB: > { %s337_s15 = sadd.s32 4294967295, %s535_s14   ;;  %s338_s16 = sadd.s32 4294967294, %s535_s14   ;;  %s535_s14 = sphi %s565_s14, %s18_s14   ;;  %s531_s13 = sphi %s563_s13, %s710_s13   ;;  %s527_s12 = sphi %s561_s12, %s709_s12   ;;  %s523_s11 = sphi %s559_s11, %s708_s11   ;;  %s519_s10 = sphi %s557_s10, %s707_s10   ;;  %s515_s9 = sphi %s555_s9, %s706_s9  }
   0x7   : > { %s30_s17 = sadd.s32 1, %s531_s13  ;;  %s39_s18 = sadd.s32 1, %s523_s11 }
   0x8   : > { %p32_p0 = scmp.ge.s32.totalorder %s30_s17, 2  ;;  %p46_p1 = scmp.ne.s32.totalorder %s523_s11, %s519_s10 }
   0x9   : > { %p47_p2 = scmp.eq.s32.totalorder %s535_s14, 0  ;;  %p52_p3 = scmp.ne.s32.totalorder %s519_s10, %s515_s9 }
   0xa   : > { %s712_s17 = smov (%p32_p0, %s30_s17), 0  ;;  %p53_p5 = scmp.eq.s32.totalorder %s337_s15, 0 }
   0xb   : > { %p596_p4 = por %p47_p2, %p46_p1  ;;  %s34_s20 = ssub.s32 %s531_s13, %s712_s17 }
   0xc   : > { %p99_p6 = scmp.eq.s32.totalorder %s337_s15, 1  ;;  %p37_p7 = scmp.eq.s32.totalorder %s34_s20, 0 }
   0xd   : > { %p602_p8 = por %p53_p5, %p52_p3  ;;  %p105_p10 = scmp.eq.s32.totalorder %s338_s16, 1 }
   0xe   : > { %p606_p9 = por %p99_p6, %p46_p1  ;;  %p366_p13 = scmp.lt.s32.totalorder %s535_s14, 2 }
   0xf   : > { %s611_s23 = scalar_select %p37_p7, %s523_s11, %s39_s18  }
  0x10   : > { %p613_p11 = por %p105_p10, %p52_p3  ;;  %s128_s25 = sand.u32 1, %s523_s11  }
  0x11   : > { %s341_s26 = sshll.u32 %s128_s25, 3  ;;  %s352_s27 = sshll.u32 %s531_s13, 7 }
  0x12   : > { %s702_s24 = scalar_select %p613_p11, 1, 0 }
  0x13   : > { %s140_s30 = scalar_lea.hbm %s696_s0, %s352_s27  ;;  %s132_s3 = scalar_lea.vmem [#allocation2], %s341_s26 }
  0x14   : > { %s142_s4 = sshll.u32 %s132_s3, 4  ;;  %p626_p0 = pnand %p366_p13, %p596_p4  ;;  %s143_s4 = int_to_ptr.vmem [resolvable:$true] %s142_s4 }
  0x15   : > { %p344_p1 = scmp.ge.s32.totalorder %s535_s14, 1  ;;  %p147_p2 = scmp.lt.s32.totalorder %s535_s14, 3 }
  0x16   : > { %s129_s6 = scalar_lea.sflag [#allocation3], %s128_s25  ;;  %p429_p3 = pneg %p626_p0 }
  0x17   : > { %s440_s7 = scalar_lea.vmem %s143_s4, 128  ;;  %s537_s8 = smov [#allocation2]  }
  0x18   : > { %p441_p5 = scmp.ne.s32.totalorder %s143_s4, %s440_s7  ;;  %s445_s15 = sshll.u32 %s537_s8, 4  ;;  %s446_s15 = int_to_ptr.vmem [resolvable:$false] %s445_s15 }
  0x19   : > { %s447_s16 = scalar_lea.vmem %s446_s15, 256  ;;  %p448_p10 = scmp.lt.s32.totalorder %s143_s4, %s446_s15 }
  0x1a   : > { %p443_p6 = pnand %p441_p5, %p429_p3  ;;  %p449_p12 = scmp.lt.s32.totalorder %s447_s16, %s440_s7 }
  0x1c   : > { %p444_p7 = pneg %p443_p6  ;;  %p450_p4 = por %p449_p12, %p448_p10 }
  0x1e   : > { %p451_p13 = pnand %p450_p4, %p444_p7 }
  0x20   : > { %454 = shalt.err (!%p451_p13)
}
  0x21   : > { %361 = dma.hbm_to_vmem [thread:$0]  (!%p626_p0), %s140_s30, 128, %s143_s4, %s129_s6  }
  0x22   : > { %p148_p11 = pnand %p344_p1, %p147_p2 }
  0x23   : > { %s641_s18 = sand.u32 (!%p148_p11), 1, %s519_s10  }
  0x24   : > { %151 = sbr.rel (%p148_p11) target bundleno = 187 (0xbb), region = 28  ;;  %s345_s19 = sshll.u32 (!%p148_p11), %s641_s18, 3 }
  0x25   : > { %s154_s20 = scalar_lea.sflag (!%p148_p11), [#allocation3], %s641_s18  ;;  %s157_s25 = scalar_lea.vmem (!%p148_p11), [#allocation2], %s345_s19 }
  0x29   : > { %506 = dma.done.wait (%p602_p8), %s154_s20, 128  }
  0x2a   : > { %508 = vsyncadd (%p602_p8), %s154_s20, 4294967168  ;;  %v538_v0 = vmov 0   ;;  %v181_v1 = vld [vmem:[%s697_s1] sm:$0xf]  ;;  %vm186_vm0 = vcmask 1043456   ;;  %s353_s21 = sshll.u32 %s527_s12, 7 }
  0x2b   : > { %417 = vset.pattern.permute.xlu0 %v538_v0  ;;  %v180_v2 = vld [vmem:[%s157_s25] sm:$0xff]  ;;  %s177_s28 = scalar_lea.vmem [#allocation5], %s345_s19  ;;  %s251_s4 = scalar_lea.hbm %s698_s2, %s353_s21 }
  0x2c   : > { %221 = vperm.xlu0 %417, %v181_v1   ;;  %v182_v3 = vmul.f32 %v180_v2, %v180_v2  ;;  %v225_v31 = vcombine.high %v180_v2, %v180_v2  ;;  %s253_s29 = sshll.u32 %s177_s28, 4  ;;  %s237_s5 = scalar_lea.sflag [#allocation4], %s641_s18  ;;  %s254_s29 = int_to_ptr.vmem [resolvable:$true] %s253_s29 }
  0x2d   : > { %s455_s6 = scalar_lea.vmem %s254_s29, 128  ;;  %s539_s7 = smov [#allocation5]  }
  0x2e   : > { %v184_v4 = vcombine.high %v182_v3, %v182_v3  ;;  %v187_v5 = vsel %vm186_vm0, %v182_v3, 0.0  ;;  %p456_p8 = scmp.ne.s32.totalorder %s254_s29, %s455_s6  ;;  %s459_s12 = sshll.u32 %s539_s7, 4  ;;  %s460_s12 = int_to_ptr.vmem [resolvable:$false] %s459_s12 }
  0x2f   : > { %v188_v7 = vrot.slane %v187_v5, 4  ;;  %s461_s8 = scalar_lea.vmem %s460_s12, 256  ;;  %p462_p0 = scmp.lt.s32.totalorder %s254_s29, %s460_s12 }
  0x30   : > { %v194_v6 = vsel %vm186_vm0, %v184_v4, 0.0  ;;  %p457_p11 = pnand %p456_p8, %p606_p9  ;;  %p463_p1 = scmp.lt.s32.totalorder %s461_s8, %s455_s6 }
  0x31   : > { %v195_v8 = vrot.slane %v194_v6, 4  ;;  %v189_v9 = vadd.f32 %v188_v7, %v187_v5 }
  0x32   : > { %p458_p12 = pneg %p457_p11  ;;  %p464_p2 = por %p463_p1, %p462_p0 }
  0x33   : > { %v196_v10 = vadd.f32 %v195_v8, %v194_v6  ;;  %v190_v11 = vrot.slane %v189_v9, 2 }
  0x34   : > { %p465_p3 = pnand %p464_p2, %p458_p12 }
  0x35   : > { %v197_v12 = vrot.slane %v196_v10, 2  ;;  %v191_v13 = vadd.f32 %v190_v11, %v189_v9 }
  0x37   : > { %v198_v14 = vadd.f32 %v197_v12, %v196_v10  ;;  %v192_v15 = vrot.slane %v191_v13, 1 }
  0x39   : > { %v199_v16 = vrot.slane %v198_v14, 1  ;;  %v193_v17 = vadd.f32 %v192_v15, %v191_v13 }
  0x3b   : > { %v200_v18 = vadd.f32 %v199_v16, %v198_v14  ;;  %419 = vrsqrt.f32 %v193_v17  ;;  %vm203_vm1 = vcmp.eq.f32.partialorder %v193_v17, inf  ;;  %v206_v23 = vand.u32 2147483648, %v193_v17 }
  0x3c   : > { %vm205_vm3 = vcmp.eq.f32.partialorder %v193_v17, 0.0 }
  0x3d   : > { %421 = vrsqrt.f32 %v200_v18  ;;  %vm210_vm2 = vcmp.eq.f32.partialorder %v200_v18, inf  ;;  %v213_v25 = vand.u32 2147483648, %v200_v18  ;;  %vm212_vm4 = vcmp.eq.f32.partialorder %v200_v18, 0.0 }
  0x48   : > { %v420_v19 = vpop.eup %419 }
  0x49   : > { %v202_v21 = vmul.f32 %v420_v19, %v193_v17 }
  0x4a   : > { %v422_v20 = vpop.eup %421 }
  0x4b   : > { %v209_v22 = vmul.f32 %v422_v20, %v200_v18  ;;  %v204_v24 = vsel %vm203_vm1, %v193_v17, %v202_v21 }
  0x4c   : > { %v207_v27 = vsel %vm205_vm3, %v206_v23, %v204_v24 }
  0x4d   : > { %v211_v26 = vsel %vm210_vm2, %v200_v18, %v209_v22  ;;  %v215_v29 = vadd.f32 1e-10, %v207_v27 }
  0x4e   : > { %v214_v28 = vsel %vm212_vm4, %v213_v25, %v211_v26 }
  0x4f   : > { %v216_v30 = vadd.f32 1e-10, %v214_v28  ;;  %423 = vrcp.f32 %v215_v29 }
  0x51   : > { %425 = vrcp.f32 %v216_v30 }
  0x5c   : > { %v424_v32 = vpop.eup %423 }
  0x5e   : > { %v426_v33 = vpop.eup %425 }
  0xa7   : > { %v222_v34 = vpop.permute.xlu0 %221 }
  0xa8   : > { %v227_v35 = vmul.f32 %v222_v34, %v180_v2  ;;  %v228_v36 = vmul.f32 %v225_v31, %v222_v34 }
  0xaa   : > { %v229_v37 = vmul.f32 %v424_v32, %v227_v35  ;;  %v230_v38 = vmul.f32 %v426_v33, %v228_v36 }
  0xac   : > { %v233_v39 = vcombine.low %v229_v37, %v230_v38 }
  0xae   : > { %235 = vst [vmem:[%s177_s28] sm:$0xff] %v233_v39 }
  0xaf   : > { %468 = shalt.err (!%p465_p3)
}
  0xb0   : > { %s469_s15 = scalar_lea.hbm %s251_s4, 128  ;;  %s473_s19 = scalar_lea.hbm %s698_s2, 256 }
  0xb1   : > { %p470_p5 = scmp.ne.s32.totalorder %s251_s4, %s469_s15  ;;  %p474_p10 = scmp.lt.s32.totalorder %s251_s4, %s698_s2 }
  0xb2   : > { %p475_p4 = scmp.lt.s32.totalorder %s473_s19, %s469_s15 }
  0xb3   : > { %p471_p6 = pnand %p470_p5, %p606_p9 }
  0xb4   : > { %p476_p13 = por %p475_p4, %p474_p10 }
  0xb5   : > { %p472_p7 = pneg %p471_p6 }
  0xb7   : > { %p477_p8 = pnand %p476_p13, %p472_p7 }
  0xb9   : > { %480 = shalt.err (!%p477_p8)
}
  0xba   : > { %356 = dma.vmem_to_hbm [thread:$0]  (%p606_p9), %s254_s29, 128, %s251_s4, %s237_s5  }
  0xbb PF: > { %s265_s26 = sand.u32 1, %s515_s9   ;;  %p704_p11 = scmp.ne.s32.totalorder %s702_s24, 0 }
  0xbc   : > { %p705_p12 = scmp.ge.s32.totalorder %s535_s14, 2  ;;  %s266_s27 = scalar_lea.sflag [#allocation4], %s265_s26 }
  0xbe   : > { %p363_p0 = pnand %p705_p12, %p704_p11 }
  0xc0   : > { %p364_p1 = pneg %p363_p0 }
  0xc2   : > { %510 = dma.done.wait (%p364_p1), %s266_s27, 128  }
  0xc3   : > { %512 = vsyncadd (%p364_p1), %s266_s27, 4294967168  ;;  %s18_s14 = sadd.s32 1, %s535_s14   ;;  %s706_s9 = smov %s519_s10 }
  0xc4   : > { %p15_p2 = scmp.ge.s32.totalorder %s18_s14, 4   ;;  %s707_s10 = smov %s523_s11 }
  0xc5   : > { %s708_s11 = smov %s611_s23  ;;  %s709_s12 = smov %s531_s13 }
  0xc6   : > { %s710_s13 = smov %s712_s17  ;;  %17 = sbr.rel (!%p15_p2) target bundleno = 6 (0x6), region = 73 }
  0xcb   :  { %271 = vsyncpa [#allocation3], 1 }
  0xcc   :  { %273 = vsyncpa [#allocation3 + $0x1], 1 }
  0xcd   :  { %274 = vsyncpa [#allocation4], 1 }
  0xce   :  { %276 = vsyncpa [#allocation4 + $0x1], 1 }

</bundles_post_ra>
